<compile_context>
chip_gen: v6e
topology: v6e:2x2x1
jax: 0.10.0
libtpu: 0.0.40
codegen_flags: <defaults>
</compile_context>

<pallas_src>
import functools

import jax
import jax.numpy as jnp
from jax import lax
from jax.experimental import pallas as pl
from jax.experimental.pallas import tpu as pltpu


def _round_up(x, m):
    return ((x + m - 1) // m) * m


def _conv_body(x, h, w_ref, b_ref, o_ref, k, dilation):
    """x: (C_in, l_tile); h: (C_in, halo_up) or None; o_ref: (C_out, n_out)."""
    n_out = o_ref.shape[-1]
    # Lane-aligned window: x is a multiple of 128 wide, h is 128*m wide.
    win = x if h is None else jnp.concatenate([x, h], axis=1)
    if k > 1:
        # im2col: stack the k dilated taps along the contraction (sublane) axis
        # so the whole tile is ONE MXU matmul.
        slab = jnp.concatenate(
            [win[:, t * dilation: t * dilation + n_out] for t in range(k)],
            axis=0)                                   # (k*C_in, n_out)
    else:
        slab = win if n_out == win.shape[1] else win[:, :n_out]
    acc = jnp.dot(w_ref[...], slab, preferred_element_type=jnp.float32)
    o_ref[...] = (acc + b_ref[...]).astype(o_ref.dtype)


def _kernel_halo(x_ref, h_ref, w_ref, b_ref, o_ref, *, k, dilation):
    _conv_body(x_ref[...], h_ref[...], w_ref, b_ref, o_ref, k, dilation)


def _kernel_nohalo(x_ref, w_ref, b_ref, o_ref, *, k, dilation):
    _conv_body(x_ref[...], None, w_ref, b_ref, o_ref, k, dilation)


def _vmem_per_step(lt, c_in, c_out, k, halo_up, in_bytes, out_bytes):
    """Rough per-grid-step VMEM footprint (bytes), double-buffered I/O blocks."""
    win = c_in * (lt + halo_up)
    slab = k * c_in * lt
    return (2 * c_in * lt * in_bytes            # main input tile  (x2 buffers)
            + 2 * c_in * halo_up * in_bytes     # halo tile        (x2 buffers)
            + 2 * c_out * lt * out_bytes        # output tile      (x2 buffers)
            + (win + slab) * in_bytes           # in-kernel window + im2col slab
            + c_out * lt * 4                    # f32 accumulator
            + 2 * (c_out * k * c_in * in_bytes + c_out * 4))   # weights + bias


def conv1d_same(x, w, b, *, dilation=1, l_tile=None, compute_dtype=None):
    """x: (N, C_in, L), w: (C_out, C_in, K), b: (C_out,) -> (N, C_out, L)."""
    n, c_in, length = x.shape
    c_out, _, k = w.shape

    # Same padding amounts as the PyTorch module (ReflectionPad1d((ka, kb))).
    ka = k // 2
    kb = ka - 1 if k % 2 == 0 else ka
    if dilation > 1:
        ka *= dilation
        kb *= dilation
    halo = ka + kb                          # == (k - 1) * dilation
    if max(ka, kb) >= length:
        raise ValueError(
            f"reflection pad must be < sequence length (ka={ka}, kb={kb}, L={length})")

    out_dtype = x.dtype
    cdt = jnp.dtype(compute_dtype) if compute_dtype is not None else jnp.dtype(x.dtype)
    if cdt != jnp.dtype(x.dtype):
        x = x.astype(cdt)                   # cast BEFORE padding (single fused pass)

    in_bytes = cdt.itemsize
    out_bytes = jnp.dtype(out_dtype).itemsize
    halo_up = _round_up(halo, 128) if halo > 0 else 0   # lane-dense halo block width

    # ---- choose the L tile --------------------------------------------------
    length_up = _round_up(length, 128)
    if l_tile is not None:
        lt = max(128, (int(l_tile) // 128) * 128)
    else:
        lt = min(4096, length_up)           # big tiles amortize per-step overhead
        budget = 20 * 1024 * 1024           # keeps 2x footprint well inside v7x VMEM
        while lt > 128 and _vmem_per_step(lt, c_in, c_out, k, halo_up,
                                          in_bytes, out_bytes) > budget:
            lt -= 128
        # keep >= 2 parallel grid steps so v7x's second TensorCore has work.
        if n * pl.cdiv(length, lt) < 2 and length_up >= 256:
            lt = _round_up(pl.cdiv(length, 2), 128)
    lt = max(128, min(lt, length_up))
    if halo_up:
        lt = _round_up(lt, halo_up)         # halo block index must land on tile ends

    num_tiles = pl.cdiv(length, lt)
    l_full = num_tiles * lt
    out_lt = lt if num_tiles > 1 else length    # full-dim block when single tile

    # ---- padded input: reflect (ka, kb) then zero tail; XLA fuses the chain --
    x_r = jnp.pad(x, ((0, 0), (0, 0), (ka, kb)), mode="reflect")
    tail = l_full + halo_up - x_r.shape[2]
    x_p = jnp.pad(x_r, ((0, 0), (0, 0), (0, tail))) if tail > 0 else x_r

    # ---- im2col weight fold: column t*C_in + c matches slab row ordering -----
    w_2d = jnp.transpose(w, (0, 2, 1)).reshape(c_out, k * c_in).astype(cdt)
    b_2d = b.reshape(c_out, 1).astype(jnp.float32)

    x_spec = pl.BlockSpec((None, c_in, lt), lambda i, j: (i, 0, j))
    w_spec = pl.BlockSpec((c_out, k * c_in), lambda i, j: (0, 0))
    b_spec = pl.BlockSpec((c_out, 1), lambda i, j: (0, 0))
    o_spec = pl.BlockSpec((None, c_out, out_lt), lambda i, j: (i, 0, j))

    if k > 1:
        # Right halo = first halo_up columns of the NEXT tile, read from the
        # same padded array via a lane-dense Blocked spec (no gather, no tiny DMA).
        hb = lt // halo_up
        h_spec = pl.BlockSpec((None, c_in, halo_up),
                              lambda i, j: (i, 0, (j + 1) * hb))
        in_specs = [x_spec, h_spec, w_spec, b_spec]
        operands = (x_p, x_p, w_2d, b_2d)
        kernel = functools.partial(_kernel_halo, k=k, dilation=dilation)
    else:
        in_specs = [x_spec, w_spec, b_spec]
        operands = (x_p, w_2d, b_2d)
        kernel = functools.partial(_kernel_nohalo, k=k, dilation=dilation)

    fp = _vmem_per_step(lt, c_in, c_out, k, halo_up, in_bytes, out_bytes)
    vmem_limit = int(min(48 * 1024 * 1024,
                         max(2 * fp + (2 << 20), 16 * 1024 * 1024)))

    return pl.pallas_call(
        kernel,
        out_shape=jax.ShapeDtypeStruct((n, c_out, length), out_dtype),
        grid_spec=pltpu.PrefetchScalarGridSpec(
            num_scalar_prefetch=0,
            grid=(n, num_tiles),
            in_specs=in_specs,
            out_specs=o_spec,
        ),
        compiler_params=pltpu.CompilerParams(
            dimension_semantics=("parallel", "parallel"),
            vmem_limit_bytes=vmem_limit,
        ),
    )(*operands)


def _reference_conv1d_same(x, w, b, *, dilation=1):
    """Pure-JAX reference matching torch: ReflectionPad1d + Conv1d."""
    k = w.shape[2]
    ka = k // 2
    kb = ka - 1 if k % 2 == 0 else ka
    if dilation > 1:
        ka *= dilation
        kb *= dilation
    x_pad = jnp.pad(x, ((0, 0), (0, 0), (ka, kb)), mode="reflect")
    out = lax.conv_general_dilated(
        x_pad, w,
        window_strides=(1,),
        padding="VALID",
        rhs_dilation=(dilation,),
        dimension_numbers=("NCH", "OIH", "NCH"),
    )
    return out + b[None, :, None]


if __name__ == "__main__":
    conv = jax.jit(conv1d_same, static_argnames=("dilation", "l_tile", "compute_dtype"))

    # Config 1: the module's test configuration (odd kernel, dilation 2).
    k1, k2, k3 = jax.random.split(jax.random.PRNGKey(0), 3)
    x1 = jax.random.normal(k1, (2, 4, 16), dtype=jnp.float32)
    w1 = jax.random.normal(k2, (8, 4, 3), dtype=jnp.float32) * 0.1
    b1 = jax.random.normal(k3, (8,), dtype=jnp.float32) * 0.1
    o1 = jax.block_until_ready(conv(x1, w1, b1, dilation=2))
    r1 = _reference_conv1d_same(x1, w1, b1, dilation=2)
    assert o1.shape == (2, 8, 16), o1.shape
    assert jnp.allclose(o1, r1, atol=1e-5, rtol=1e-5), float(jnp.max(jnp.abs(o1 - r1)))

    # Config 2: multiple L tiles, odd channel counts, even kernel, partial last block.
    k4, k5, k6 = jax.random.split(jax.random.PRNGKey(1), 3)
    x2 = jax.random.normal(k4, (2, 5, 300), dtype=jnp.float32)
    w2 = jax.random.normal(k5, (6, 5, 4), dtype=jnp.float32) * 0.1
    b2 = jax.random.normal(k6, (6,), dtype=jnp.float32) * 0.1
    o2 = jax.block_until_ready(conv(x2, w2, b2, dilation=1, l_tile=128))
    r2 = _reference_conv1d_same(x2, w2, b2, dilation=1)
    assert o2.shape == (2, 6, 300), o2.shape
    assert jnp.allclose(o2, r2, atol=1e-5, rtol=1e-5), float(jnp.max(jnp.abs(o2 - r2)))

    # Config 3: pointwise (k=1) path; batch 1 -> L axis split into >=2 grid steps.
    k7, k8, k9 = jax.random.split(jax.random.PRNGKey(2), 3)
    x3 = jax.random.normal(k7, (1, 3, 200), dtype=jnp.float32)
    w3 = jax.random.normal(k8, (4, 3, 1), dtype=jnp.float32) * 0.1
    b3 = jax.random.normal(k9, (4,), dtype=jnp.float32) * 0.1
    o3 = jax.block_until_ready(conv(x3, w3, b3, dilation=1))
    r3 = _reference_conv1d_same(x3, w3, b3, dilation=1)
    assert o3.shape == (1, 4, 200), o3.shape
    assert jnp.allclose(o3, r3, atol=1e-5, rtol=1e-5), float(jnp.max(jnp.abs(o3 - r3)))

    print("KERNEL_OK")
</pallas_src>

<mosaic_0001>
module attributes {stable_mosaic.version = 11 : i64} {
  func.func @_kernel_halo(%arg0: i32, %arg1: i32, %arg2: memref<1x4x128xf32, #tpu.memory_space<vmem>>, %arg3: memref<1x4x128xf32, #tpu.memory_space<vmem>>, %arg4: memref<8x12xf32, #tpu.memory_space<vmem>>, %arg5: memref<8x1xf32, #tpu.memory_space<vmem>>, %arg6: memref<1x8x16xf32, #tpu.memory_space<vmem>>) attributes {dimension_semantics = [#tpu.dimension_semantics<parallel>, #tpu.dimension_semantics<parallel>], iteration_bounds = array<i64: 2, 1>, scalar_prefetch = 0 : i64, scratch_operands = 0 : i64, tpu.core_type = #tpu.core_type<tc>, window_params = [{transform_indices = @transform_0, window_bounds = array<i64: 1, 4, 128>}, {transform_indices = @transform_1, window_bounds = array<i64: 1, 4, 128>}, {pipeline_mode = #tpu.pipeline_mode<synchronous>, transform_indices = @transform_2, window_bounds = array<i64: 8, 12>}, {pipeline_mode = #tpu.pipeline_mode<synchronous>, transform_indices = @transform_3, window_bounds = array<i64: 8, 1>}, {transform_indices = @transform_4, window_bounds = array<i64: 1, 8, 16>}]} {
    %c0 = arith.constant 0 : index
    %c0_0 = arith.constant 0 : index
    %c0_1 = arith.constant 0 : index
    %0 = vector.load %arg2[%c0, %c0_0, %c0_1] : memref<1x4x128xf32, #tpu.memory_space<vmem>>, vector<1x4x128xf32>
    %1 = vector.shape_cast %0 : vector<1x4x128xf32> to vector<4x128xf32>
    %c0_2 = arith.constant 0 : index
    %c0_3 = arith.constant 0 : index
    %c0_4 = arith.constant 0 : index
    %2 = vector.load %arg3[%c0_2, %c0_3, %c0_4] : memref<1x4x128xf32, #tpu.memory_space<vmem>>, vector<1x4x128xf32>
    %3 = vector.shape_cast %2 : vector<1x4x128xf32> to vector<4x128xf32>
    %4 = tpu.concatenate %1, %3 in 1 : vector<4x128xf32>, vector<4x128xf32> -> vector<4x256xf32>
    %5 = vector.extract_strided_slice %4 {offsets = [0, 0], sizes = [4, 16], strides = [1, 1]} : vector<4x256xf32> to vector<4x16xf32>
    %6 = vector.extract_strided_slice %4 {offsets = [0, 2], sizes = [4, 16], strides = [1, 1]} : vector<4x256xf32> to vector<4x16xf32>
    %7 = vector.extract_strided_slice %4 {offsets = [0, 4], sizes = [4, 16], strides = [1, 1]} : vector<4x256xf32> to vector<4x16xf32>
    %8 = tpu.concatenate %5, %6, %7 in 0 : vector<4x16xf32>, vector<4x16xf32>, vector<4x16xf32> -> vector<12x16xf32>
    %c0_5 = arith.constant 0 : index
    %c0_6 = arith.constant 0 : index
    %9 = vector.load %arg4[%c0_5, %c0_6] : memref<8x12xf32, #tpu.memory_space<vmem>>, vector<8x12xf32>
    %cst = arith.constant dense<0.000000e+00> : vector<8x16xf32>
    %10 = tpu.matmul %9, %8, %cst {dimension_numbers = #tpu.dot_dimension_numbers<[1], [0], [0], [1], [0, 0, 1, 1], [], []>} : vector<8x12xf32>, vector<12x16xf32>, vector<8x16xf32> -> vector<8x16xf32>
    %c0_7 = arith.constant 0 : index
    %c0_8 = arith.constant 0 : index
    %11 = vector.load %arg5[%c0_7, %c0_8] : memref<8x1xf32, #tpu.memory_space<vmem>>, vector<8x1xf32>
    %12 = vector.broadcast %11 : vector<8x1xf32> to vector<8x16xf32>
    %13 = arith.addf %10, %12 : vector<8x16xf32>
    %c0_9 = arith.constant 0 : index
    %c0_10 = arith.constant 0 : index
    %c0_11 = arith.constant 0 : index
    %14 = vector.load %arg6[%c0_9, %c0_10, %c0_11] : memref<1x8x16xf32, #tpu.memory_space<vmem>>, vector<1x8x16xf32>
    %15 = vector.shape_cast %14 : vector<1x8x16xf32> to vector<8x16xf32>
    %16 = vector.shape_cast %13 : vector<8x16xf32> to vector<1x8x16xf32>
    tpu.vector_store %arg6[%c0_9, %c0_10, %c0_11], %16 {strides = array<i32>} : memref<1x8x16xf32, #tpu.memory_space<vmem>>, vector<1x8x16xf32>,
    return
  }
  func.func @transform_0(%arg0: i32, %arg1: i32) -> (i32, i32, i32) {
    %c0_i32 = arith.constant 0 : i32
    %c0_i32_0 = arith.constant 0 : i32
    return %arg0, %c0_i32, %arg1 : i32, i32, i32
  }
  func.func @transform_1(%arg0: i32, %arg1: i32) -> (i32, i32, i32) {
    %c1_i32 = arith.constant 1 : i32
    %0 = arith.addi %arg1, %c1_i32 : i32
    %c1_i32_0 = arith.constant 1 : i32
    %1 = arith.muli %0, %c1_i32_0 : i32
    %c0_i32 = arith.constant 0 : i32
    %c0_i32_1 = arith.constant 0 : i32
    return %arg0, %c0_i32, %1 : i32, i32, i32
  }
  func.func @transform_2(%arg0: i32, %arg1: i32) -> (i32, i32) {
    %c0_i32 = arith.constant 0 : i32
    %c0_i32_0 = arith.constant 0 : i32
    %c0_i32_1 = arith.constant 0 : i32
    return %c0_i32, %c0_i32_0 : i32, i32
  }
  func.func @transform_3(%arg0: i32, %arg1: i32) -> (i32, i32) {
    %c0_i32 = arith.constant 0 : i32
    %c0_i32_0 = arith.constant 0 : i32
    %c0_i32_1 = arith.constant 0 : i32
    return %c0_i32, %c0_i32_0 : i32, i32
  }
  func.func @transform_4(%arg0: i32, %arg1: i32) -> (i32, i32, i32) {
    %c0_i32 = arith.constant 0 : i32
    %c0_i32_0 = arith.constant 0 : i32
    return %arg0, %c0_i32, %arg1 : i32, i32, i32
  }
}

</mosaic_0001>

<bundles_post_ra>
// kernel: conv1d_same.1
= control target key start
LH: loop header
LB: loop body
LE: loop exit
PB: predicated region body
PF: predicated region fallthrough
CT: control target
= control target key end

     0   :  { %9 = vsyncpa [#allocation3], 0  ;;  %s768_s0 = inlined_call_operand.vmem [shape: f32[2,4,256], index: 0, kind: input, shape index: {}, may-alias: {0,1}]   ;;  %s769_s1 = inlined_call_operand.vmem [shape: f32[2,4,256], index: 1, kind: input, shape index: {}, may-alias: {0,1}]   ;;  %s770_s2 = inlined_call_operand.vmem [shape: f32[8,12], index: 2, kind: input, shape index: {}]   ;;  %s771_s3 = inlined_call_operand.vmem [shape: f32[8,1], index: 3, kind: input, shape index: {}]   ;;  %s772_s4 = inlined_call_operand.hbm [shape: f32[2,8,16], index: 4, kind: output, shape index: {}]  }
   0x1   :  { %11 = vsyncpa [#allocation3 + $0x1], 0  ;;  %s657_s15 = smov 0   ;;  %s659_s16 = smov 0  }
   0x2   :  { %s661_s17 = smov 0   ;;  %s663_s18 = smov 0  }
   0x3   :  { %s665_s1 = smov 0   ;;  %s667_s19 = smov 0  }
   0x4 LB: > { %s461_s20 = sadd.s32 4294967295, %s624_s19   ;;  %s462_s21 = sadd.s32 4294967294, %s624_s19   ;;  %s624_s19 = sphi %s667_s19, %s17_s19   ;;  %s620_s1 = sphi %s665_s1, %s779_s1   ;;  %s616_s18 = sphi %s663_s18, %s778_s18   ;;  %s612_s17 = sphi %s661_s17, %s777_s17   ;;  %s608_s16 = sphi %s659_s16, %s776_s16   ;;  %s604_s15 = sphi %s657_s15, %s775_s15  }
   0x5   : > { %s29_s22 = sadd.s32 1, %s620_s1  ;;  %s138_s23 = sadd.s32 1, %s612_s17 }
   0x6   : > { %p31_p0 = scmp.ge.s32.totalorder %s29_s22, 2  ;;  %p148_p1 = scmp.ne.s32.totalorder %s612_s17, %s608_s16 }
   0x7   : > { %p149_p2 = scmp.eq.s32.totalorder %s461_s20, 1  ;;  %p154_p3 = scmp.ne.s32.totalorder %s608_s16, %s604_s15 }
   0x8   : > { %s781_s22 = smov (%p31_p0, %s29_s22), 0  ;;  %p155_p5 = scmp.eq.s32.totalorder %s462_s21, 1 }
   0x9   : > { %p697_p4 = por %p149_p2, %p148_p1  ;;  %s133_s25 = ssub.s32 %s620_s1, %s781_s22 }
   0xa   : > { %p465_p6 = scmp.ge.s32.totalorder %s624_s19, 1  ;;  %p136_p7 = scmp.eq.s32.totalorder %s133_s25, 0 }
   0xb   : > { %p704_p8 = por %p155_p5, %p154_p3  ;;  %p203_p9 = scmp.lt.s32.totalorder %s624_s19, 3 }
   0xc   : > { %s710_s27 = scalar_select %p136_p7, %s612_s17, %s138_s23  }
   0xd   : > { %p204_p10 = pnand %p465_p6, %p203_p9 }
   0xe   : > { %p241_p11 = scmp.lt.s32.totalorder (!%p204_p10), %s616_s18, 1  ;;  %s629_s9 = smov (!%p204_p10), 124  }
   0xf   : > { %207 = sbr.rel (%p204_p10) target bundleno = 354 (0x162), region = 36  ;;  %s630_s10 = smov (!%p204_p10), 126  }
  0x10   : > { %s238_s13 = sand.u32 (!%p204_p10), 1, %s608_s16   ;;  %s472_s20 = sshll.u32 (!%p204_p10), %s616_s18, 7 }
  0x11   : > { %s466_s14 = sshll.u32 (!%p204_p10), %s238_s13, 3  ;;  %s728_s29 = scalar_lea.hbm (!%p204_p10), %s772_s4, %s472_s20 }
  0x12   : > { %s240_s21 = scalar_lea.vmem (!%p204_p10), [#allocation2], %s466_s14 }
  0x13   : > { %s369_s23 = sshll.u32 (!%p204_p10), %s240_s21, 4  ;;  %s370_s23 = int_to_ptr.vmem [resolvable:$true] %s369_s23 }
  0x14   : > { %v626_v0 = vmov 0.0   ;;  %vm627_vm0 = vmmov 0   ;;  %v270_v1 = vld [vmem:[%s771_s3] sm:$0xff]  ;;  %s242_s30 = scalar_select %p241_p11, %s616_s18, 1  ;;  %v628_v2 = vmov 0   ;;  %vm267_vm1 = vcmask 1043456  }
  0x15   : > { %479 = vmatprep.subr.mxu0 %v626_v0  ;;  %483 = vmatprep.mubr.msk.f32.mxu0 %vm627_vm0, %v626_v0  ;;  %v269_v7 = vld [vmem:[%s770_s2] sm:$0xff]  ;;  %vm276_vm2 = vcmask 97280   ;;  %vm352_vm3 = vcmask 130048   ;;  %s631_s18 = smov [#allocation2]  }
  0x16   : > { %546 = vset.pattern.permute.xlu1 %v628_v2  ;;  %547 = vset.pattern.permute.xlu0 %v628_v2  ;;  %s475_s5 = sshll.u32 %s242_s30, 3  ;;  %s355_s30 = scalar_lea.sflag [#allocation3], %s238_s13 }
  0x17   : > { %273 = vperm.xlu1 %546, %v270_v1   ;;  %s248_s8 = scalar_lea.vmem %s768_s0, %s475_s5  ;;  %s548_s5 = scalar_lea.vmem %s370_s23, 128 }
  0x18   : > { %v259_v3 = vld [vmem:[%s248_s8] sm:$0xf]  ;;  %p549_p12 = scmp.ne.s32.totalorder %s370_s23, %s548_s5  ;;  %s552_s6 = sshll.u32 %s631_s18, 4  ;;  %s553_s6 = int_to_ptr.vmem [resolvable:$false] %s552_s6 }
  0x19   : > { %265 = vrot.lane.b32.xlu0 %v259_v3, %s629_s9  ;;  %v261_v4 = vrot.slane %v259_v3, 4  ;;  %s554_s7 = scalar_lea.vmem %s553_s6, 256  ;;  %p555_p1 = scmp.lt.s32.totalorder %s370_s23, %s553_s6 }
  0x1a   : > { %p550_p13 = pnand %p549_p12, %p697_p4  ;;  %p556_p2 = scmp.lt.s32.totalorder %s554_s7, %s548_s5 }
  0x1c   : > { %p551_p0 = pneg %p550_p13  ;;  %p557_p3 = por %p556_p2, %p555_p1 }
  0x1d   : > { %262 = vrot.lane.b32.xlu0 %v261_v4, %s630_s10 }
  0x1e   : > { %p558_p5 = pnand %p557_p3, %p551_p0 }
  0x8b   : > { %v266_v5 = vpop.permute.xlu0 %265 }
  0x8c   : > { %480 = vmatpush3.msk.msra.mxu0 %vm267_vm1, %v266_v5 }
  0x8d   : > { %481 = vmatprep.subr.mxu0 %v626_v0 }
  0x8f   : > { %v263_v6 = vpop.permute.xlu0 %262 }
  0x90   : > { %v268_v8 = vsel %vm267_vm1, %v259_v3, %v263_v6 }
  0x91   : > { %482 = vmatpush3.msra.mxu0 %v268_v8 }
  0x92   : > { %484 = vmatmul.mubr.msk.f32.vlgmr.msra.gmra.mxu0 %vm276_vm2, %v269_v7  ;;  %v274_v9 = vpop.permute.xlu1 %273 }
 0x152   : > { %v348_v10 = vpop.f32.mrf.mxu0 }
 0x153   : > { %v349_v11 = vadd.f32 %v348_v10, %v274_v9 }
 0x154   : > { %v485_v12 = vpop.f32.mrf.mxu0 }
 0x155   : > { %353 = vst.msk [vmem:[%s240_s21] sm:$0xff] %vm352_vm3, %v349_v11 }
 0x156   : > { %561 = shalt.err (!%p558_p5)
}
 0x157   : > { %s562_s8 = scalar_lea.hbm %s728_s29, 128  ;;  %s566_s11 = scalar_lea.hbm %s772_s4, 256 }
 0x158   : > { %p563_p6 = scmp.ne.s32.totalorder %s728_s29, %s562_s8  ;;  %p567_p10 = scmp.lt.s32.totalorder %s728_s29, %s772_s4 }
 0x159   : > { %p568_p11 = scmp.lt.s32.totalorder %s566_s11, %s562_s8 }
 0x15a   : > { %p564_p7 = pnand %p563_p6, %p697_p4 }
 0x15b   : > { %p569_p12 = por %p568_p11, %p567_p10 }
 0x15c   : > { %p565_p9 = pneg %p564_p7 }
 0x15e   : > { %p570_p13 = pnand %p569_p12, %p565_p9 }
 0x160   : > { %573 = shalt.err (!%p570_p13)
}
 0x161   : > { %486 = dma.vmem_to_hbm [thread:$0]  (%p697_p4), %s370_s23, 128, %s728_s29, %s355_s30  }
 0x162 PF: > { %p492_p0 = scmp.ge.s32.totalorder %s624_s19, 2  ;;  %s381_s14 = sand.u32 1, %s604_s15  }
 0x163   : > { %s382_s20 = scalar_lea.sflag [#allocation3], %s381_s14 }
 0x164   : > { %p489_p1 = pnand %p492_p0, %p704_p8 }
 0x166   : > { %p490_p2 = pneg %p489_p1 }
 0x168   : > { %599 = dma.done.wait (%p490_p2), %s382_s20, 128  }
 0x169   : > { %601 = vsyncadd (%p490_p2), %s382_s20, 4294967168  ;;  %s17_s19 = sadd.s32 1, %s624_s19   ;;  %s775_s15 = smov %s608_s16 }
 0x16a   : > { %p14_p3 = scmp.ge.s32.totalorder %s17_s19, 4   ;;  %s776_s16 = smov %s612_s17 }
 0x16b   : > { %s777_s17 = smov %s710_s27  ;;  %s778_s18 = smov %s620_s1 }
 0x16c   : > { %s779_s1 = smov %s781_s22  ;;  %16 = sbr.rel (!%p14_p3) target bundleno = 4 (0x4), region = 74 }
 0x171   :  { %387 = vsyncpa [#allocation3], 1 }
 0x172   :  { %389 = vsyncpa [#allocation3 + $0x1], 1 }

</bundles_post_ra>
